<compile_context>
chip_gen: v5e
topology: v5e:2x2
jax: 0.10.0
libtpu: 0.0.40
codegen_flags: <defaults>
</compile_context>

<pallas_src>
import jax
import jax.numpy as jnp
from jax.experimental import pallas as pl
from jax.experimental.pallas import tpu as pltpu

_LANE = 128
_SUBLANE = 8


def _round_up(v, m):
    return -(-v // m) * m


def _cdiv(a, b):
    return -(-a // b)


def _pad2(a, rows, cols, dtype):
    """Zero-pad a (possibly smaller) 2-D array to (rows, cols) in `dtype`."""
    a = jnp.asarray(a, dtype)
    if a.shape == (rows, cols):
        return a
    out = jnp.zeros((rows, cols), dtype)
    return out.at[: a.shape[0], : a.shape[1]].set(a)


def _bnn_two_layer_kernel(x_ref, h_ref, eta_ref, fcw_ref, fcb_ref, zeta_ref,
                          out_ref, acc_ref):
    """One (batch-tile, K-tile) grid step: accumulate x@H, fused epilogue at the end."""
    k = pl.program_id(1)

    @pl.when(k == 0)
    def _init():
        acc_ref[...] = jnp.zeros_like(acc_ref)

    # Accumulate x_tile @ H_tile into the f32 scratch (MXU, f32 accumulation).
    acc_ref[...] += jnp.dot(x_ref[...], h_ref[...],
                            preferred_element_type=jnp.float32)

    @pl.when(k == pl.num_programs(1) - 1)
    def _finalize():
        h1 = jnp.maximum(acc_ref[...] + eta_ref[...], 0.0)
        h2 = jnp.dot(h1.astype(fcw_ref.dtype), fcw_ref[...],
                     preferred_element_type=jnp.float32) + fcb_ref[...]
        h2 = jnp.maximum(h2, 0.0)
        out_ref[...] = jnp.dot(h2.astype(zeta_ref.dtype), zeta_ref[...],
                               preferred_element_type=jnp.float32)


def bnnstgp_two_layer_forward(x, w, params, lamb=1.0,
                              compute_dtype=jnp.bfloat16,
                              bt_target=512, tk_target=2048):
    """Pallas-backed forward. `w` is unused by BNNSTGP_two_layer.forward."""
    del w  # unused in forward (only alpha/log_prior use it)
    f32 = jnp.float32

    batch, input_dim = x.shape
    n_knots, n_hid = params["b"].shape
    n_hid2, output_dim = params["zeta"].shape

    # ---- Hoisted once-per-call precompute (plain XLA, f32): ------------------
    #   H = sigma * (phi@b - clip(phi@b, -lamb, lamb))      # (input_dim, n_hid)
    # This removes the per-batch-tile phi@b recompute from the kernel; sigma is
    # folded into H so the kernel needs no scalar argument.
    h_full = jnp.dot(params["phi"].astype(f32), params["b"].astype(f32))
    h_full = h_full - jnp.clip(h_full, -float(lamb), float(lamb))
    h_full = params["sigma"].astype(f32) * h_full

    # Lane-dense padding of the small feature dims.
    nh_p = _round_up(n_hid, _LANE)
    nh2_p = _round_up(n_hid2, _LANE)
    out_p = _round_up(output_dim, _LANE)

    # input_dim (reduction) tiling.
    if input_dim <= tk_target:
        tk = _round_up(input_dim, _LANE)
        k_pad = tk
    else:
        tk = tk_target
        k_pad = _round_up(input_dim, tk)
    nk = k_pad // tk

    # batch (parallel) tiling: keep >=2 batch tiles whenever batch >= 16 so the
    # "parallel" axis can be split across v7x's two TensorCores, while choosing
    # nb = cdiv(batch, bt_target) to minimize padding for large batches.
    b_min = _round_up(batch, _SUBLANE)
    if b_min <= bt_target:
        nb = 2 if batch >= 2 * _SUBLANE else 1
    else:
        nb = _cdiv(batch, bt_target)
    bt = _round_up(_cdiv(batch, nb), _SUBLANE)
    b_pad = nb * bt

    # Zero-padded streaming operands.  Padded H rows/cols, eta/fc_b cols, fc_W
    # rows and zeta rows are zero, so padding never leaks into real outputs.
    x_p = _pad2(x, b_pad, k_pad, compute_dtype)
    h_p = _pad2(h_full, k_pad, nh_p, compute_dtype)
    eta_p = _pad2(jnp.reshape(params["eta"], (1, -1)), 1, nh_p, f32)
    fcw_p = _pad2(params["fc_weight"].T, nh_p, nh2_p, compute_dtype)
    fcb_p = _pad2(jnp.reshape(params["fc_bias"], (1, -1)), 1, nh2_p, f32)
    zeta_p = _pad2(params["zeta"], nh2_p, out_p, compute_dtype)

    grid = (nb, nk)

    in_specs = [
        pl.BlockSpec((bt, tk), lambda i, k: (i, k)),        # x tile (streamed)
        pl.BlockSpec((tk, nh_p), lambda i, k: (k, 0)),      # H tile (streamed)
        pl.BlockSpec((1, nh_p), lambda i, k: (0, 0)),       # eta (resident)
        pl.BlockSpec((nh_p, nh2_p), lambda i, k: (0, 0)),   # fc_W^T (resident)
        pl.BlockSpec((1, nh2_p), lambda i, k: (0, 0)),      # fc_b (resident)
        pl.BlockSpec((nh2_p, out_p), lambda i, k: (0, 0)),  # zeta (resident)
    ]
    out_spec = pl.BlockSpec((bt, out_p), lambda i, k: (i, 0))

    # VMEM budget: actual double-buffered tile footprint with ~2x headroom,
    # clamped so it stays safe on v5e/v6e (128 MiB) and v7x (64 MiB physical).
    isz = jnp.dtype(compute_dtype).itemsize
    tile_bytes = (2 * bt * tk * isz            # x (double-buffered)
                  + 2 * tk * nh_p * isz        # H (double-buffered)
                  + 2 * nh_p * 4               # eta
                  + 2 * nh_p * nh2_p * isz     # fc_W^T
                  + 2 * nh2_p * 4              # fc_b
                  + 2 * nh2_p * out_p * isz    # zeta
                  + 2 * bt * out_p * 4         # out
                  + bt * nh_p * 4)             # acc scratch
    vmem_limit = int(min(max(2 * tile_bytes, 24 << 20), 48 << 20))

    flops = int(2 * b_pad * k_pad * nh_p        # x @ H
                + 2 * b_pad * nh_p * nh2_p      # fc
                + 2 * b_pad * nh2_p * out_p)    # @ zeta
    bytes_accessed = int(x_p.nbytes + nb * h_p.nbytes + eta_p.nbytes
                         + fcw_p.nbytes + fcb_p.nbytes + zeta_p.nbytes
                         + b_pad * out_p * 4)

    out_padded = pl.pallas_call(
        _bnn_two_layer_kernel,
        out_shape=jax.ShapeDtypeStruct((b_pad, out_p), f32),
        grid_spec=pltpu.PrefetchScalarGridSpec(
            num_scalar_prefetch=0,
            grid=grid,
            in_specs=in_specs,
            out_specs=out_spec,
            scratch_shapes=[pltpu.VMEM((bt, nh_p), f32)],
        ),
        compiler_params=pltpu.CompilerParams(
            dimension_semantics=("parallel", "arbitrary"),
            vmem_limit_bytes=vmem_limit,
        ),
        cost_estimate=pl.CostEstimate(flops=flops, transcendentals=0,
                                      bytes_accessed=bytes_accessed),
    )(x_p, h_p, eta_p, fcw_p, fcb_p, zeta_p)

    return out_padded[:batch, :output_dim]


def _reference_forward(x, params, lamb=1.0):
    """Plain-JAX f32 reference mirroring the PyTorch forward exactly."""
    h = params["phi"] @ params["b"]
    h = jnp.maximum(h, lamb) - jnp.maximum(-h, lamb)
    h = params["sigma"] * h
    h1 = jax.nn.relu(x @ h + params["eta"])
    h2 = jax.nn.relu(h1 @ params["fc_weight"].T + params["fc_bias"])
    return h2 @ params["zeta"]


def _reference_forward_cast(x, params, lamb=1.0, dtype=jnp.bfloat16):
    """Reference mirroring the kernel's precision path (f32 H, low-prec streams)."""
    f32 = jnp.float32
    h = jnp.dot(params["phi"].astype(f32), params["b"].astype(f32))
    h = h - jnp.clip(h, -lamb, lamb)
    h = params["sigma"].astype(f32) * h
    acc = jnp.dot(x.astype(dtype), h.astype(dtype), preferred_element_type=f32)
    h1 = jnp.maximum(acc + params["eta"].astype(f32), 0.0)
    h2 = jnp.dot(h1.astype(dtype), params["fc_weight"].T.astype(dtype),
                 preferred_element_type=f32) + params["fc_bias"].astype(f32)
    h2 = jnp.maximum(h2, 0.0)
    return jnp.dot(h2.astype(dtype), params["zeta"].astype(dtype),
                   preferred_element_type=f32)


def _init_params(key, input_dim, n_hid, n_hid2, output_dim, w_dim, n_knots):
    """Deterministic parameter init mirroring the PyTorch __init__ shapes."""
    k_phi, k_b, k_zeta, k_fcw, k_fcb = jax.random.split(key, 5)
    bound = 1.0 / jnp.sqrt(n_hid)  # nn.Linear default-style bound
    return {
        "phi": jax.random.normal(k_phi, (input_dim, n_knots), jnp.float32),
        "sigma": jnp.array(1.0, jnp.float32),
        "b": jax.random.normal(k_b, (n_knots, n_hid), jnp.float32),
        "zeta": jax.random.uniform(k_zeta, (n_hid2, output_dim), jnp.float32,
                                   minval=-1.0, maxval=1.0),
        "eta": jnp.zeros((n_hid,), jnp.float32),
        "alpha": jnp.zeros((w_dim, output_dim), jnp.float32),  # unused in forward
        "fc_weight": jax.random.uniform(k_fcw, (n_hid2, n_hid), jnp.float32,
                                        minval=-bound, maxval=bound),
        "fc_bias": jax.random.uniform(k_fcb, (n_hid2,), jnp.float32,
                                      minval=-bound, maxval=bound),
    }


if __name__ == "__main__":
    key = jax.random.PRNGKey(0)

    # ---- Small shapes (single grid step per axis) ----------------------------
    batch, input_dim, n_hid, n_hid2, output_dim, w_dim, n_knots = 2, 16, 32, 16, 4, 3, 8
    lamb = 1.0
    k_params, k_x, k_w, k_rest = jax.random.split(key, 4)
    params = _init_params(k_params, input_dim, n_hid, n_hid2, output_dim, w_dim, n_knots)
    x = jax.random.normal(k_x, (batch, input_dim), jnp.float32)
    w = jax.random.normal(k_w, (batch, w_dim), jnp.float32)  # unused in forward

    # Strict check at f32 streaming precision.
    out_f32 = jax.block_until_ready(
        bnnstgp_two_layer_forward(x, w, params, lamb=lamb, compute_dtype=jnp.float32))
    ref = _reference_forward(x, params, lamb=lamb)
    assert out_f32.shape == (batch, output_dim)
    assert jnp.allclose(out_f32, ref, atol=1e-4, rtol=1e-4), (out_f32, ref)

    # Default bf16 streaming, checked against a precision-mirrored reference.
    out_bf16 = jax.block_until_ready(
        bnnstgp_two_layer_forward(x, w, params, lamb=lamb))
    ref_bf16 = _reference_forward_cast(x, params, lamb=lamb, dtype=jnp.bfloat16)
    assert jnp.allclose(out_bf16, ref_bf16, atol=2e-2, rtol=2e-2), (out_bf16, ref_bf16)

    # ---- Larger shapes: batch split across >=2 tiles (megacore) --------------
    batch2, input_dim2, n_hid_2, n_hid2_2, out_dim2, w_dim2, n_knots2 = 300, 1200, 64, 48, 4, 3, 24
    kp2, kx2, kw2, ke2 = jax.random.split(k_rest, 4)
    params2 = _init_params(kp2, input_dim2, n_hid_2, n_hid2_2, out_dim2, w_dim2, n_knots2)
    params2["sigma"] = jnp.array(0.8, jnp.float32)
    params2["eta"] = 0.1 * jax.random.normal(ke2, (n_hid_2,), jnp.float32)
    x2 = jax.random.normal(kx2, (batch2, input_dim2), jnp.float32)
    w2 = jax.random.normal(kw2, (batch2, w_dim2), jnp.float32)

    out2_f32 = jax.block_until_ready(
        bnnstgp_two_layer_forward(x2, w2, params2, lamb=lamb, compute_dtype=jnp.float32))
    ref2 = _reference_forward(x2, params2, lamb=lamb)
    assert out2_f32.shape == (batch2, out_dim2)
    assert jnp.allclose(out2_f32, ref2, atol=2e-2, rtol=2e-3), (out2_f32, ref2)

    out2_bf16 = jax.block_until_ready(
        bnnstgp_two_layer_forward(x2, w2, params2, lamb=lamb))
    ref2_bf16 = _reference_forward_cast(x2, params2, lamb=lamb, dtype=jnp.bfloat16)
    assert jnp.allclose(out2_bf16, ref2_bf16, atol=2e-2, rtol=2e-2), (out2_bf16, ref2_bf16)

    # ---- Same shapes with forced small tiles: exercises multi-step K-reduction
    # and multi-tile batch pipelining explicitly.
    out2_tiled = jax.block_until_ready(
        bnnstgp_two_layer_forward(x2, w2, params2, lamb=lamb,
                                  compute_dtype=jnp.float32,
                                  bt_target=128, tk_target=256))
    assert jnp.allclose(out2_tiled, ref2, atol=2e-2, rtol=2e-3), (out2_tiled, ref2)

    print("KERNEL_OK")
</pallas_src>

<mosaic_0001>
module attributes {stable_mosaic.version = 11 : i64} {
  func.func @_bnn_two_layer_kernel(%arg0: i32, %arg1: i32, %arg2: memref<8x128xf32, #tpu.memory_space<vmem>>, %arg3: memref<128x128xf32, #tpu.memory_space<vmem>>, %arg4: memref<1x128xf32, #tpu.memory_space<vmem>>, %arg5: memref<128x128xf32, #tpu.memory_space<vmem>>, %arg6: memref<1x128xf32, #tpu.memory_space<vmem>>, %arg7: memref<128x128xf32, #tpu.memory_space<vmem>>, %arg8: memref<8x128xf32, #tpu.memory_space<vmem>>, %arg9: memref<8x128xf32, #tpu.memory_space<vmem>>) attributes {dimension_semantics = [#tpu.dimension_semantics<parallel>, #tpu.dimension_semantics<arbitrary>], iteration_bounds = array<i64: 1, 1>, scalar_prefetch = 0 : i64, scratch_operands = 1 : i64, tpu.core_type = #tpu.core_type<tc>, window_params = [{transform_indices = @transform_0, window_bounds = array<i64: 8, 128>}, {transform_indices = @transform_1, window_bounds = array<i64: 128, 128>}, {pipeline_mode = #tpu.pipeline_mode<synchronous>, transform_indices = @transform_2, window_bounds = array<i64: 1, 128>}, {pipeline_mode = #tpu.pipeline_mode<synchronous>, transform_indices = @transform_3, window_bounds = array<i64: 128, 128>}, {pipeline_mode = #tpu.pipeline_mode<synchronous>, transform_indices = @transform_4, window_bounds = array<i64: 1, 128>}, {pipeline_mode = #tpu.pipeline_mode<synchronous>, transform_indices = @transform_5, window_bounds = array<i64: 128, 128>}, {transform_indices = @transform_6, window_bounds = array<i64: 8, 128>}]} {
    %c0_i32 = arith.constant 0 : i32
    %0 = arith.cmpi eq, %arg1, %c0_i32 : i32
    %1 = arith.extui %0 : i1 to i32
    %c0_i32_0 = arith.constant 0 : i32
    %2 = arith.cmpi ne, %1, %c0_i32_0 : i32
    scf.if %2 {
      %cst_10 = arith.constant 0.000000e+00 : f32
      %12 = vector.broadcast %cst_10 : f32 to vector<8x128xf32>
      %c0_11 = arith.constant 0 : index
      %c0_12 = arith.constant 0 : index
      %13 = vector.load %arg9[%c0_11, %c0_12] : memref<8x128xf32, #tpu.memory_space<vmem>>, vector<8x128xf32>
      tpu.vector_store %arg9[%c0_11, %c0_12], %12 {strides = array<i32>} : memref<8x128xf32, #tpu.memory_space<vmem>>, vector<8x128xf32>,
    } else {
    }
    %c0 = arith.constant 0 : index
    %c0_1 = arith.constant 0 : index
    %3 = vector.load %arg9[%c0, %c0_1] : memref<8x128xf32, #tpu.memory_space<vmem>>, vector<8x128xf32>
    %c0_2 = arith.constant 0 : index
    %c0_3 = arith.constant 0 : index
    %4 = vector.load %arg2[%c0_2, %c0_3] : memref<8x128xf32, #tpu.memory_space<vmem>>, vector<8x128xf32>
    %c0_4 = arith.constant 0 : index
    %c0_5 = arith.constant 0 : index
    %5 = vector.load %arg3[%c0_4, %c0_5] : memref<128x128xf32, #tpu.memory_space<vmem>>, vector<128x128xf32>
    %cst = arith.constant dense<0.000000e+00> : vector<8x128xf32>
    %6 = tpu.matmul %4, %5, %cst {dimension_numbers = #tpu.dot_dimension_numbers<[1], [0], [0], [1], [0, 0, 1, 1], [], []>} : vector<8x128xf32>, vector<128x128xf32>, vector<8x128xf32> -> vector<8x128xf32>
    %7 = arith.addf %3, %6 : vector<8x128xf32>
    %c0_6 = arith.constant 0 : index
    %c0_7 = arith.constant 0 : index
    %8 = vector.load %arg9[%c0_6, %c0_7] : memref<8x128xf32, #tpu.memory_space<vmem>>, vector<8x128xf32>
    tpu.vector_store %arg9[%c0_6, %c0_7], %7 {strides = array<i32>} : memref<8x128xf32, #tpu.memory_space<vmem>>, vector<8x128xf32>,
    %c0_i32_8 = arith.constant 0 : i32
    %9 = arith.cmpi eq, %arg1, %c0_i32_8 : i32
    %10 = arith.extui %9 : i1 to i32
    %c0_i32_9 = arith.constant 0 : i32
    %11 = arith.cmpi ne, %10, %c0_i32_9 : i32
    scf.if %11 {
      %c0_10 = arith.constant 0 : index
      %c0_11 = arith.constant 0 : index
      %12 = vector.load %arg9[%c0_10, %c0_11] : memref<8x128xf32, #tpu.memory_space<vmem>>, vector<8x128xf32>
      %c0_12 = arith.constant 0 : index
      %c0_13 = arith.constant 0 : index
      %13 = vector.load %arg4[%c0_12, %c0_13] : memref<1x128xf32, #tpu.memory_space<vmem>>, vector<1x128xf32>
      %14 = vector.broadcast %13 : vector<1x128xf32> to vector<8x128xf32>
      %15 = arith.addf %12, %14 : vector<8x128xf32>
      %cst_14 = arith.constant 0.000000e+00 : f32
      %16 = vector.broadcast %cst_14 : f32 to vector<8x128xf32>
      %17 = arith.maximumf %15, %16 : vector<8x128xf32>
      %c0_15 = arith.constant 0 : index
      %c0_16 = arith.constant 0 : index
      %18 = vector.load %arg5[%c0_15, %c0_16] : memref<128x128xf32, #tpu.memory_space<vmem>>, vector<128x128xf32>
      %cst_17 = arith.constant dense<0.000000e+00> : vector<8x128xf32>
      %19 = tpu.matmul %17, %18, %cst_17 {dimension_numbers = #tpu.dot_dimension_numbers<[1], [0], [0], [1], [0, 0, 1, 1], [], []>} : vector<8x128xf32>, vector<128x128xf32>, vector<8x128xf32> -> vector<8x128xf32>
      %c0_18 = arith.constant 0 : index
      %c0_19 = arith.constant 0 : index
      %20 = vector.load %arg6[%c0_18, %c0_19] : memref<1x128xf32, #tpu.memory_space<vmem>>, vector<1x128xf32>
      %21 = vector.broadcast %20 : vector<1x128xf32> to vector<8x128xf32>
      %22 = arith.addf %19, %21 : vector<8x128xf32>
      %cst_20 = arith.constant 0.000000e+00 : f32
      %23 = vector.broadcast %cst_20 : f32 to vector<8x128xf32>
      %24 = arith.maximumf %22, %23 : vector<8x128xf32>
      %c0_21 = arith.constant 0 : index
      %c0_22 = arith.constant 0 : index
      %25 = vector.load %arg7[%c0_21, %c0_22] : memref<128x128xf32, #tpu.memory_space<vmem>>, vector<128x128xf32>
      %cst_23 = arith.constant dense<0.000000e+00> : vector<8x128xf32>
      %26 = tpu.matmul %24, %25, %cst_23 {dimension_numbers = #tpu.dot_dimension_numbers<[1], [0], [0], [1], [0, 0, 1, 1], [], []>} : vector<8x128xf32>, vector<128x128xf32>, vector<8x128xf32> -> vector<8x128xf32>
      %c0_24 = arith.constant 0 : index
      %c0_25 = arith.constant 0 : index
      %27 = vector.load %arg8[%c0_24, %c0_25] : memref<8x128xf32, #tpu.memory_space<vmem>>, vector<8x128xf32>
      tpu.vector_store %arg8[%c0_24, %c0_25], %26 {strides = array<i32>} : memref<8x128xf32, #tpu.memory_space<vmem>>, vector<8x128xf32>,
    } else {
    }
    return
  }
  func.func @transform_0(%arg0: i32, %arg1: i32) -> (i32, i32) {
    %c0_i32 = arith.constant 0 : i32
    return %arg0, %arg1 : i32, i32
  }
  func.func @transform_1(%arg0: i32, %arg1: i32) -> (i32, i32) {
    %c0_i32 = arith.constant 0 : i32
    %c0_i32_0 = arith.constant 0 : i32
    return %arg1, %c0_i32 : i32, i32
  }
  func.func @transform_2(%arg0: i32, %arg1: i32) -> (i32, i32) {
    %c0_i32 = arith.constant 0 : i32
    %c0_i32_0 = arith.constant 0 : i32
    %c0_i32_1 = arith.constant 0 : i32
    return %c0_i32, %c0_i32_0 : i32, i32
  }
  func.func @transform_3(%arg0: i32, %arg1: i32) -> (i32, i32) {
    %c0_i32 = arith.constant 0 : i32
    %c0_i32_0 = arith.constant 0 : i32
    %c0_i32_1 = arith.constant 0 : i32
    return %c0_i32, %c0_i32_0 : i32, i32
  }
  func.func @transform_4(%arg0: i32, %arg1: i32) -> (i32, i32) {
    %c0_i32 = arith.constant 0 : i32
    %c0_i32_0 = arith.constant 0 : i32
    %c0_i32_1 = arith.constant 0 : i32
    return %c0_i32, %c0_i32_0 : i32, i32
  }
  func.func @transform_5(%arg0: i32, %arg1: i32) -> (i32, i32) {
    %c0_i32 = arith.constant 0 : i32
    %c0_i32_0 = arith.constant 0 : i32
    %c0_i32_1 = arith.constant 0 : i32
    return %c0_i32, %c0_i32_0 : i32, i32
  }
  func.func @transform_6(%arg0: i32, %arg1: i32) -> (i32, i32) {
    %c0_i32 = arith.constant 0 : i32
    %c0_i32_0 = arith.constant 0 : i32
    return %arg0, %c0_i32 : i32, i32
  }
}

</mosaic_0001>

<bundles_post_ra>
// kernel: tpu_custom_call.1
= control target key start
LH: loop header
LB: loop body
LE: loop exit
PB: predicated region body
PF: predicated region fallthrough
CT: control target
= control target key end

     0   :  { %11 = vsyncpa [#allocation4], 0  ;;  %s437_s0 = inlined_call_operand.hbm [shape: f32[8,128], index: 0, kind: input, shape index: {}]   ;;  %s438_s1 = inlined_call_operand.hbm [shape: f32[128,128], index: 1, kind: input, shape index: {}]   ;;  %s439_s2 = inlined_call_operand.vmem [shape: f32[1,128], index: 2, kind: input, shape index: {}]   ;;  %s440_s3 = inlined_call_operand.hbm [shape: f32[128,128], index: 3, kind: input, shape index: {}]   ;;  %s441_s4 = inlined_call_operand.vmem [shape: f32[1,128], index: 4, kind: input, shape index: {}]   ;;  %s442_s5 = inlined_call_operand.hbm [shape: f32[128,128], index: 5, kind: input, shape index: {}]   ;;  %s443_s6 = inlined_call_operand.hbm [shape: f32[8,128], index: 6, kind: output, shape index: {}]  }
   0x1   :  { %12 = vsyncpa [#allocation7], 0 }
   0x2   :  { %13 = vsyncpa [#allocation10], 0  ;;  %s30_s23 = sshll.u32 %s438_s1, 4  ;;  %s31_s23 = int_to_ptr.hbm [resolvable:$true] %s30_s23 }
   0x3   :  { %14 = vsyncpa [#allocation5], 0  ;;  %s374_s24 = smov [#allocation6]   ;;  %s20_s28 = sshll.u32 %s437_s0, 4  ;;  %s21_s28 = int_to_ptr.hbm [resolvable:$true] %s20_s28 }
   0x4   :  { %s32_s25 = sshll.u32 %s374_s24, 4  ;;  %s375_s29 = smov 128   ;;  %s33_s25 = int_to_ptr.vmem [resolvable:$true] %s32_s25 }
   0x5   :  { %s376_s30 = smov 8   ;;  %s377_s7 = smov [#allocation3]  }
   0x6   :  { %38 = dma.hbm_to_vmem [thread:$0]  %s31_s23, 2048, %s33_s25, [#allocation7], %s375_s29, %s375_s29, %s376_s30  }
   0x7   :  { %s22_s8 = sshll.u32 %s377_s7, 4  ;;  %s45_s11 = sshll.u32 %s440_s3, 4  ;;  %s23_s8 = int_to_ptr.vmem [resolvable:$true] %s22_s8  ;;  %s46_s11 = int_to_ptr.hbm [resolvable:$true] %s45_s11 }
   0x8   :  { %25 = dma.hbm_to_vmem [thread:$0]  %s21_s28, 128, %s23_s8, [#allocation4]  }
   0x9   :  { %s60_s13 = sshll.u32 %s442_s5, 4  ;;  %s378_s14 = smov [#allocation8]   ;;  %s61_s13 = int_to_ptr.hbm [resolvable:$true] %s60_s13 }
   0xa   :  { %s47_s15 = sshll.u32 %s378_s14, 4  ;;  %s379_s0 = smov [#allocation9]   ;;  %s48_s15 = int_to_ptr.vmem [resolvable:$true] %s47_s15 }
   0xb   :  { %53 = dma.hbm_to_vmem [thread:$0]  %s46_s11, 2048, %s48_s15, [#allocation7], %s375_s29, %s375_s29, %s376_s30  }
   0xc   :  { %s62_s16 = sshll.u32 %s379_s0, 4  ;;  %s63_s16 = int_to_ptr.vmem [resolvable:$true] %s62_s16 }
   0xd   :  { %68 = dma.hbm_to_vmem [thread:$0]  %s61_s13, 2048, %s63_s16, [#allocation10], %s375_s29, %s375_s29, %s376_s30  }
   0xe   :  { %366 = dma.done.wait [#allocation4], 128  }
   0xf   :  { %367 = vsyncadd [#allocation4], 4294967168 }
  0x10   :  { %368 = dma.done.wait [#allocation7], 4096  }
  0x11   :  { %369 = vsyncadd [#allocation7], 4294963200 }
  0x12   :  { %370 = dma.done.wait [#allocation10], 2048  }
  0x13   :  { %371 = vsyncadd [#allocation10], 4294965248  ;;  %v107_v0 = vld [vmem:[#allocation6 + $0x78] sm:$0xff]  ;;  %v106_v1 = vld [vmem:[#allocation6 + $0x70] sm:$0xff]  ;;  %s225_s22 = sshll.u32 %s443_s6, 4  ;;  %s226_s22 = int_to_ptr.hbm [resolvable:$true] %s225_s22 }
  0x14   :  { %108 = vmatpush.msra.mxu0 %v107_v0  ;;  %v105_v2 = vld [vmem:[#allocation6 + $0x68] sm:$0xff]  ;;  %v104_v3 = vld [vmem:[#allocation6 + $0x60] sm:$0xff]  ;;  %v155_v4 = vld [vmem:[#allocation8 + $0x78] sm:$0xff] }
  0x15   :  { %v103_v5 = vld [vmem:[#allocation6 + $0x58] sm:$0xff]  ;;  %160 = vmatpush.msra.mxu1 %v155_v4  ;;  %v154_v6 = vld [vmem:[#allocation8 + $0x70] sm:$0xff]  ;;  %v153_v7 = vld [vmem:[#allocation8 + $0x68] sm:$0xff] }
  0x16   :  { %109 = vmatpush.msra.mxu0 %v106_v1  ;;  %v102_v8 = vld [vmem:[#allocation6 + $0x50] sm:$0xff]  ;;  %v152_v9 = vld [vmem:[#allocation8 + $0x60] sm:$0xff]  ;;  %v101_v10 = vld [vmem:[#allocation6 + $0x48] sm:$0xff] }
  0x17   :  { %161 = vmatpush.msra.mxu1 %v154_v6  ;;  %v151_v11 = vld [vmem:[#allocation8 + $0x58] sm:$0xff]  ;;  %v100_v12 = vld [vmem:[#allocation6 + $0x40] sm:$0xff]  ;;  %v150_v13 = vld [vmem:[#allocation8 + $0x50] sm:$0xff] }
  0x18   :  { %110 = vmatpush.msra.mxu0 %v105_v2  ;;  %v99_v14 = vld [vmem:[#allocation6 + $0x38] sm:$0xff]  ;;  %v149_v15 = vld [vmem:[#allocation8 + $0x48] sm:$0xff]  ;;  %v98_v16 = vld [vmem:[#allocation6 + $0x30] sm:$0xff] }
  0x19   :  { %162 = vmatpush.msra.mxu1 %v153_v7  ;;  %v148_v17 = vld [vmem:[#allocation8 + $0x40] sm:$0xff]  ;;  %v97_v18 = vld [vmem:[#allocation6 + $0x28] sm:$0xff]  ;;  %v147_v19 = vld [vmem:[#allocation8 + $0x38] sm:$0xff] }
  0x1a   :  { %111 = vmatpush.msra.mxu0 %v104_v3  ;;  %v96_v20 = vld [vmem:[#allocation6 + $0x20] sm:$0xff]  ;;  %v146_v21 = vld [vmem:[#allocation8 + $0x30] sm:$0xff]  ;;  %v95_v22 = vld [vmem:[#allocation6 + $0x18] sm:$0xff] }
  0x1b   :  { %163 = vmatpush.msra.mxu1 %v152_v9  ;;  %v145_v23 = vld [vmem:[#allocation8 + $0x28] sm:$0xff]  ;;  %v94_v24 = vld [vmem:[#allocation6 + $0x10] sm:$0xff]  ;;  %v144_v25 = vld [vmem:[#allocation8 + $0x20] sm:$0xff] }
  0x1c   :  { %112 = vmatpush.msra.mxu0 %v103_v5  ;;  %v93_v26 = vld [vmem:[#allocation6 + $0x8] sm:$0xff]  ;;  %v143_v27 = vld [vmem:[#allocation8 + $0x18] sm:$0xff]  ;;  %v92_v28 = vld [vmem:[#allocation6] sm:$0xff] }
  0x1d   :  { %164 = vmatpush.msra.mxu1 %v151_v11  ;;  %v91_v29 = vld [vmem:[#allocation3] sm:$0xff]  ;;  %v142_v30 = vld [vmem:[#allocation8 + $0x10] sm:$0xff]  ;;  %v141_v31 = vld [vmem:[#allocation8 + $0x8] sm:$0xff] }
  0x1e   :  { %113 = vmatpush.msra.mxu0 %v102_v8  ;;  %v140_v32 = vld [vmem:[#allocation8] sm:$0xff]  ;;  %v196_v33 = vld [vmem:[#allocation9 + $0x78] sm:$0xff]  ;;  %v195_v34 = vld [vmem:[#allocation9 + $0x70] sm:$0xff] }
  0x1f   :  { %165 = vmatpush.msra.mxu1 %v150_v13  ;;  %197 = vmatpush.msra.mxu2 %v196_v33  ;;  %v194_v35 = vld [vmem:[#allocation9 + $0x68] sm:$0xff]  ;;  %v193_v36 = vld [vmem:[#allocation9 + $0x60] sm:$0xff]  ;;  %v192_v37 = vld [vmem:[#allocation9 + $0x58] sm:$0xff] }
  0x20   :  { %114 = vmatpush.msra.mxu0 %v101_v10  ;;  %v191_v38 = vld [vmem:[#allocation9 + $0x50] sm:$0xff]  ;;  %v190_v39 = vld [vmem:[#allocation9 + $0x48] sm:$0xff]  ;;  %v189_v40 = vld [vmem:[#allocation9 + $0x40] sm:$0xff] }
  0x21   :  { %166 = vmatpush.msra.mxu1 %v149_v15  ;;  %198 = vmatpush.msra.mxu2 %v195_v34  ;;  %v188_v41 = vld [vmem:[#allocation9 + $0x38] sm:$0xff]  ;;  %v187_v42 = vld [vmem:[#allocation9 + $0x30] sm:$0xff]  ;;  %v186_v43 = vld [vmem:[#allocation9 + $0x28] sm:$0xff] }
  0x22   :  { %115 = vmatpush.msra.mxu0 %v100_v12  ;;  %v185_v44 = vld [vmem:[#allocation9 + $0x20] sm:$0xff]  ;;  %v184_v45 = vld [vmem:[#allocation9 + $0x18] sm:$0xff]  ;;  %v183_v50 = vld [vmem:[#allocation9 + $0x10] sm:$0xff] }
  0x23   :  { %167 = vmatpush.msra.mxu1 %v148_v17  ;;  %199 = vmatpush.msra.mxu2 %v194_v35  ;;  %v244_v46 = vld [vmem:[%s439_s2] ss:$0 sm:$0xff]  ;;  %v182_v51 = vld [vmem:[#allocation9 + $0x8] sm:$0xff]  ;;  %v181_v52 = vld [vmem:[#allocation9] sm:$0xff]  ;;  %s380_s2 = smov [#allocation11]  }
  0x24   :  { %116 = vmatpush.msra.mxu0 %v99_v14  ;;  %v245_v53 = vld [vmem:[%s441_s4] ss:$0 sm:$0xff]  ;;  %s223_s19 = sshll.u32 %s380_s2, 4  ;;  %s224_s19 = int_to_ptr.vmem [resolvable:$true] %s223_s19 }
  0x25   :  { %168 = vmatpush.msra.mxu1 %v147_v19  ;;  %200 = vmatpush.msra.mxu2 %v193_v36 }
  0x26   :  { %117 = vmatpush.msra.mxu0 %v98_v16 }
  0x27   :  { %169 = vmatpush.msra.mxu1 %v146_v21  ;;  %201 = vmatpush.msra.mxu2 %v192_v37 }
  0x28   :  { %118 = vmatpush.msra.mxu0 %v97_v18 }
  0x29   :  { %170 = vmatpush.msra.mxu1 %v145_v23  ;;  %202 = vmatpush.msra.mxu2 %v191_v38 }
  0x2a   :  { %119 = vmatpush.msra.mxu0 %v96_v20 }
  0x2b   :  { %171 = vmatpush.msra.mxu1 %v144_v25  ;;  %203 = vmatpush.msra.mxu2 %v190_v39 }
  0x2c   :  { %120 = vmatpush.msra.mxu0 %v95_v22 }
  0x2d   :  { %172 = vmatpush.msra.mxu1 %v143_v27  ;;  %204 = vmatpush.msra.mxu2 %v189_v40 }
  0x2e   :  { %121 = vmatpush.msra.mxu0 %v94_v24 }
  0x2f   :  { %173 = vmatpush.msra.mxu1 %v142_v30  ;;  %205 = vmatpush.msra.mxu2 %v188_v41 }
  0x30   :  { %122 = vmatpush.msra.mxu0 %v93_v26 }
  0x31   :  { %174 = vmatpush.msra.mxu1 %v141_v31  ;;  %206 = vmatpush.msra.mxu2 %v187_v42 }
  0x32   :  { %123 = vmatpush.msra.mxu0 %v92_v28 }
  0x33   :  { %124 = vmatmul.f32.vlgmr.msra.gmra.mxu0 %v91_v29  ;;  %175 = vmatpush.msra.mxu1 %v140_v32 }
  0x34   :  { %207 = vmatpush.msra.mxu2 %v186_v43 }
  0x36   :  { %208 = vmatpush.msra.mxu2 %v185_v44 }
  0x38   :  { %209 = vmatpush.msra.mxu2 %v184_v45 }
  0x3a   :  { %210 = vmatpush.msra.mxu2 %v183_v50 }
  0x3c   :  { %211 = vmatpush.msra.mxu2 %v182_v51 }
  0x3e   :  { %212 = vmatpush.msra.mxu2 %v181_v52 }
  0xb0   :  { %v125_v47 = vpop.f32.mrf.mxu0 }
  0xb1   :  { %v138_v48 = vadd.f32 %v244_v46, %v125_v47 }
  0xb3   :  { %v139_v49 = vmax.f32 %v138_v48, 0.0 }
  0xb5   :  { %176 = vmatmul.f32.vlgmr.msra.gmra.mxu1 %v139_v49 }
 0x132   :  { %v177_v54 = vpop.f32.mrf.mxu1 }
 0x133   :  { %v178_v55 = vadd.f32 %v245_v53, %v177_v54 }
 0x135   :  { %v180_v56 = vmax.f32 %v178_v55, 0.0 }
 0x137   :  { %213 = vmatmul.f32.vlgmr.msra.gmra.mxu2 %v180_v56 }
 0x1ba   :  { %v214_v57 = vpop.f32.mrf.mxu2 }
 0x1bb   :  { %217 = vst [vmem:[#allocation11] sm:$0xff] %v214_v57 }
 0x1bc   :  { %228 = dma.vmem_to_hbm [thread:$0]  %s224_s19, 128, %s226_s22, [#allocation5]  }
 0x1bd   :  { %372 = dma.done.wait [#allocation5], 128  }
 0x1be   :  { %373 = vsyncadd [#allocation5], 4294967168 }
 0x1bf   :  { %233 = vsyncpa [#allocation4], 1 }
 0x1c0   :  { %234 = vsyncpa [#allocation7], 1 }
 0x1c1   :  { %235 = vsyncpa [#allocation10], 1 }
 0x1c2   :  { %236 = vsyncpa [#allocation5], 1 }

</bundles_post_ra>
